<compile_context>
chip_gen: v7x
topology: tpu7x:2x2x1
jax: 0.10.0
libtpu: 0.0.40
codegen_flags: <defaults>
</compile_context>

<pallas_src>
import numpy as np
import jax
import jax.numpy as jnp
from jax.experimental import pallas as pl
from jax.experimental.pallas import tpu as pltpu

IMG_FEATURE = 256      # img_feature
HIDDEN = 512           # LSTM hidden size
MAX_TOKEN = 5000       # vocab size
VOCAB_PAD = 5120       # next multiple of 128 (lane-dense output slab)
BACKBONE_FEAT = 2048   # resnet152 pooled feature dim (input to the replaced fc)
BN_EPS = 1e-5


def _round_up(n, m):
    return (n + m - 1) // m * m


# ----------------------------- kernels ------------------------------------ #

def encoder_kernel(x_ref, w_ref, b_ref, gamma_ref, beta_ref, out_ref):
    # x_ref: (B, C, H*W) f32.  GAP + folded linear + BatchNorm1d (training-mode stats).
    pooled = jnp.mean(x_ref[...], axis=-1)                                   # (B, C)
    # TODO(synk): the full ResNet152 conv backbone is replaced by GAP + one folded
    # linear producing the 256-d feature (a 152-layer CNN is out of scope here).
    feat = jnp.dot(pooled, w_ref[...],
                   preferred_element_type=jnp.float32) + b_ref[...]          # (B, 256)
    mu = jnp.mean(feat, axis=0, keepdims=True)
    var = jnp.mean((feat - mu) ** 2, axis=0, keepdims=True)
    out_ref[...] = (feat - mu) * jax.lax.rsqrt(var + BN_EPS) * gamma_ref[...] + beta_ref[...]


def linear_kernel(x_ref, w_ref, b_ref, out_ref):
    # y = x @ W + b.  x is already bf16 (LSTM hidden output), W bf16, f32 accumulate.
    out_ref[...] = (jnp.dot(x_ref[...], w_ref[...],
                            preferred_element_type=jnp.float32) + b_ref[...])


def lstm_kernel(seq_ref, wih_ref, b_ref, whh_ref, out_ref, gx_scr, h_scr, c_scr):
    # seq_ref: (T*Bp, 256) f32 time-major inputs (image feature row 0, then embeddings)
    # wih_ref: (256, 4H) bf16, b_ref: (1, 4H) f32 (= b_ih + b_hh), whh_ref: (H, 4H) bf16
    # out_ref: (T*Bp, H) bf16.  gx_scr: (T*Bp, 4H) f32 scratch, h_scr/c_scr: (Bp, H) f32.
    # Gate column order (set at init): i, f, o, g.
    Bp = h_scr.shape[0]
    T = out_ref.shape[0] // Bp

    # Fused prologue: one well-shaped (T*Bp, 256) x (256, 4H) matmul for all timesteps.
    gx_scr[...] = jnp.dot(seq_ref[...].astype(jnp.bfloat16), wih_ref[...],
                          preferred_element_type=jnp.float32) + b_ref[...]
    h_scr[...] = jnp.zeros_like(h_scr)
    c_scr[...] = jnp.zeros_like(c_scr)

    def step(t, carry):
        toff = pl.multiple_of(t * Bp, Bp)
        # Per step only the recurrent matmul sits on the serial critical path.
        gates = gx_scr[pl.ds(toff, Bp), :] + jnp.dot(
            h_scr[...].astype(jnp.bfloat16), whh_ref[...],
            preferred_element_type=jnp.float32)                              # (Bp, 4H)
        ifo = jax.nn.sigmoid(gates[:, :3 * HIDDEN])                          # i | f | o
        g = jnp.tanh(gates[:, 3 * HIDDEN:])                                  # g
        i = ifo[:, 0 * HIDDEN:1 * HIDDEN]
        f = ifo[:, 1 * HIDDEN:2 * HIDDEN]
        o = ifo[:, 2 * HIDDEN:3 * HIDDEN]
        c = f * c_scr[...] + i * g
        h_new = o * jnp.tanh(c)
        c_scr[...] = c
        h_scr[...] = h_new
        out_ref[pl.ds(toff, Bp), :] = h_new.astype(out_ref.dtype)
        return carry

    # T is static and small -> full unroll for cross-iteration scheduler visibility.
    jax.lax.fori_loop(0, T, step, 0, unroll=True)


# ----------------------------- params ------------------------------------- #

def init_params(key, in_channels):
    ks = jax.random.split(key, 10)
    s = jnp.float32(0.02)
    w_backbone = jax.random.normal(ks[0], (in_channels, BACKBONE_FEAT), jnp.float32) * s
    b_backbone = jax.random.normal(ks[1], (1, BACKBONE_FEAT), jnp.float32) * s
    w_fc = jax.random.normal(ks[2], (BACKBONE_FEAT, IMG_FEATURE), jnp.float32) * s
    b_fc = jax.random.normal(ks[3], (1, IMG_FEATURE), jnp.float32) * s
    # Fold the two encoder linears (no nonlinearity in between) -> exact composition.
    w_enc = w_backbone @ w_fc                                   # (C, 256)
    b_enc = b_backbone @ w_fc + b_fc                            # (1, 256)

    w_out = jax.random.normal(ks[8], (HIDDEN, MAX_TOKEN), jnp.float32) * s
    b_out = jax.random.normal(ks[9], (1, MAX_TOKEN), jnp.float32) * s

    return {
        "w_enc": w_enc,
        "b_enc": b_enc,
        "bn_gamma": jnp.ones((1, IMG_FEATURE), jnp.float32),
        "bn_beta": jnp.zeros((1, IMG_FEATURE), jnp.float32),
        "embedding": jax.random.normal(ks[4], (MAX_TOKEN, IMG_FEATURE), jnp.float32) * s,
        # LSTM weights stored transposed (in, 4H) / (H, 4H).  Gate columns are stored
        # permuted to (i, f, o, g) so the kernel can fuse the three sigmoids into one.
        # bf16 for MXU operands, f32 biases / accumulation.
        "w_ih": (jax.random.normal(ks[5], (IMG_FEATURE, 4 * HIDDEN), jnp.float32) * s
                 ).astype(jnp.bfloat16),
        "w_hh": (jax.random.normal(ks[6], (HIDDEN, 4 * HIDDEN), jnp.float32) * s
                 ).astype(jnp.bfloat16),
        "b_lstm": jax.random.normal(ks[7], (1, 4 * HIDDEN), jnp.float32) * s,   # b_ih + b_hh
        # Vocab padded 5000 -> 5120 (lane-dense); padding columns are zero and sliced off.
        "w_out": jnp.pad(w_out, ((0, 0), (0, VOCAB_PAD - MAX_TOKEN))).astype(jnp.bfloat16),
        "b_out": jnp.pad(b_out, ((0, 0), (0, VOCAB_PAD - MAX_TOKEN))),
    }


# ----------------------------- wrapper ------------------------------------ #

def image_caption_forward(params, x, y, lengths):
    """forward(x, y, lengths): encoder -> concat(feature, embed(y)) -> LSTM -> pack -> Linear."""
    B, C, H, W = x.shape
    x_flat = x.reshape(B, C, H * W).astype(jnp.float32)

    # ---- encoder: GAP + folded linear + BatchNorm1d (training-mode batch stats) ----
    features = pl.pallas_call(
        encoder_kernel,
        out_shape=jax.ShapeDtypeStruct((B, IMG_FEATURE), jnp.float32),
    )(x_flat, params["w_enc"], params["b_enc"], params["bn_gamma"], params["bn_beta"])

    # ---- embedding + prepend image feature (JAX glue) ----
    emb = jnp.take(params["embedding"], y, axis=0)                 # (B, L, 256)
    seq = jnp.concatenate([features[:, None, :], emb], axis=1)     # (B, T, 256)
    seq_tm = jnp.transpose(seq, (1, 0, 2))                         # (T, B, 256) time-major
    T = seq_tm.shape[0]

    # Pad batch to a multiple of 16 so every per-step VMEM access is a full aligned
    # sublane tile (and bf16 output stores are unmasked full-tile stores).
    Bp = _round_up(max(B, 16), 16)
    seq_pad = jnp.pad(seq_tm, ((0, 0), (0, Bp - B), (0, 0)))       # (T, Bp, 256)
    seq_2d = seq_pad.reshape(T * Bp, IMG_FEATURE)

    # ---- LSTM: single kernel (fused input projection + unrolled recurrence) ----
    hidden_2d = pl.pallas_call(
        lstm_kernel,
        out_shape=jax.ShapeDtypeStruct((T * Bp, HIDDEN), jnp.bfloat16),
        scratch_shapes=[pltpu.VMEM((T * Bp, 4 * HIDDEN), jnp.float32),   # gx (hoisted x@W_ih)
                        pltpu.VMEM((Bp, HIDDEN), jnp.float32),           # h
                        pltpu.VMEM((Bp, HIDDEN), jnp.float32)],          # c
    )(seq_2d, params["w_ih"], params["b_lstm"], params["w_hh"])
    hidden_tm = hidden_2d.reshape(T, Bp, HIDDEN)                   # (T, Bp, 512) bf16

    # ---- pack_padded_sequence ordering (lengths sorted descending, host-side glue) ----
    lengths_np = np.asarray(lengths)
    t_idx, b_idx = [], []
    for t in range(int(lengths_np.max())):
        for b in range(B):
            if lengths_np[b] > t:
                t_idx.append(t)
                b_idx.append(b)
    packed = hidden_tm[jnp.asarray(t_idx, jnp.int32), jnp.asarray(b_idx, jnp.int32)]  # (N, 512) bf16
    N = packed.shape[0]

    # ---- output projection to vocab (lane-dense 5120-wide slab) ----
    if N <= 256:
        # Small packed length: single un-gridded call, full 5120-wide output slab.
        N_pad = _round_up(N, 8)
        packed_pad = jnp.pad(packed, ((0, N_pad - N), (0, 0)))
        y_pred_pad = pl.pallas_call(
            linear_kernel,
            out_shape=jax.ShapeDtypeStruct((N_pad, VOCAB_PAD), jnp.float32),
        )(packed_pad, params["w_out"], params["b_out"])
    else:
        # Large packed length: 256-row tiles (fills the 256-wide MXU on v6e/v7x),
        # 1280-col tiles, both grid axes parallel for megacore sharding.
        TM = 256
        TN = 1280                                                  # 5120 / 1280 = 4 column tiles
        N_pad = _round_up(N, TM)
        packed_pad = jnp.pad(packed, ((0, N_pad - N), (0, 0)))
        y_pred_pad = pl.pallas_call(
            linear_kernel,
            out_shape=jax.ShapeDtypeStruct((N_pad, VOCAB_PAD), jnp.float32),
            grid_spec=pltpu.PrefetchScalarGridSpec(
                num_scalar_prefetch=0,
                grid=(N_pad // TM, VOCAB_PAD // TN),
                in_specs=[
                    pl.BlockSpec((TM, HIDDEN), lambda i, j: (i, 0)),
                    pl.BlockSpec((HIDDEN, TN), lambda i, j: (0, j)),
                    pl.BlockSpec((1, TN), lambda i, j: (0, j)),
                ],
                out_specs=pl.BlockSpec((TM, TN), lambda i, j: (i, j)),
            ),
            compiler_params=pltpu.CompilerParams(
                dimension_semantics=("parallel", "parallel")),
        )(packed_pad, params["w_out"], params["b_out"])

    return y_pred_pad[:N, :MAX_TOKEN]                              # (sum(lengths), 5000)


# ------------------------------- main -------------------------------------- #

if __name__ == "__main__":
    key = jax.random.PRNGKey(0)
    B, C, H, W, L = 2, 3, 16, 16, 8
    kx, ky, kp = jax.random.split(key, 3)

    x = jax.random.normal(kx, (B, C, H, W), jnp.float32)           # NCHW images
    y = jax.random.randint(ky, (B, L), 0, MAX_TOKEN, dtype=jnp.int32)
    lengths = [9, 7]   # sorted descending (pack_padded_sequence enforce_sorted), each <= L+1

    params = init_params(kp, C)
    y_pred = image_caption_forward(params, x, y, lengths)
    y_pred = jax.block_until_ready(y_pred)

    assert y_pred.shape == (sum(lengths), MAX_TOKEN), y_pred.shape
    assert bool(jnp.all(jnp.isfinite(y_pred)))
    print("KERNEL_OK")
</pallas_src>

<mosaic_0001>
module attributes {stable_mosaic.version = 11 : i64} {
  func.func @encoder_kernel(%arg0: memref<2x3x256xf32, #tpu.memory_space<vmem>>, %arg1: memref<3x256xf32, #tpu.memory_space<vmem>>, %arg2: memref<1x256xf32, #tpu.memory_space<vmem>>, %arg3: memref<1x256xf32, #tpu.memory_space<vmem>>, %arg4: memref<1x256xf32, #tpu.memory_space<vmem>>, %arg5: memref<2x256xf32, #tpu.memory_space<vmem>>) attributes {dimension_semantics = [], scalar_prefetch = 0 : i64, scratch_operands = 0 : i64, tpu.core_type = #tpu.core_type<tc>} {
    %c0 = arith.constant 0 : index
    %c0_0 = arith.constant 0 : index
    %c0_1 = arith.constant 0 : index
    %0 = vector.load %arg0[%c0, %c0_0, %c0_1] : memref<2x3x256xf32, #tpu.memory_space<vmem>>, vector<2x3x256xf32>
    %cst = arith.constant dense<0.000000e+00> : vector<2x3xf32>
    %1 = vector.multi_reduction <add>, %0, %cst [2] : vector<2x3x256xf32> to vector<2x3xf32>
    %cst_2 = arith.constant 2.560000e+02 : f32
    %2 = vector.broadcast %cst_2 : f32 to vector<2x3xf32>
    %3 = arith.divf %1, %2 : vector<2x3xf32>
    %c0_3 = arith.constant 0 : index
    %c0_4 = arith.constant 0 : index
    %4 = vector.load %arg1[%c0_3, %c0_4] : memref<3x256xf32, #tpu.memory_space<vmem>>, vector<3x256xf32>
    %cst_5 = arith.constant dense<0.000000e+00> : vector<2x256xf32>
    %5 = tpu.matmul %3, %4, %cst_5 {dimension_numbers = #tpu.dot_dimension_numbers<[1], [0], [0], [1], [0, 0, 1, 1], [], []>} : vector<2x3xf32>, vector<3x256xf32>, vector<2x256xf32> -> vector<2x256xf32>
    %c0_6 = arith.constant 0 : index
    %c0_7 = arith.constant 0 : index
    %6 = vector.load %arg2[%c0_6, %c0_7] : memref<1x256xf32, #tpu.memory_space<vmem>>, vector<1x256xf32>
    %7 = vector.broadcast %6 : vector<1x256xf32> to vector<2x256xf32>
    %8 = arith.addf %5, %7 : vector<2x256xf32>
    %cst_8 = arith.constant dense<0.000000e+00> : vector<256xf32>
    %9 = vector.multi_reduction <add>, %8, %cst_8 [0] : vector<2x256xf32> to vector<256xf32>
    %10 = vector.shape_cast %9 : vector<256xf32> to vector<1x256xf32>
    %cst_9 = arith.constant 2.000000e+00 : f32
    %11 = vector.broadcast %cst_9 : f32 to vector<1x256xf32>
    %12 = arith.divf %10, %11 : vector<1x256xf32>
    %13 = vector.broadcast %12 : vector<1x256xf32> to vector<2x256xf32>
    %14 = arith.subf %8, %13 : vector<2x256xf32>
    %15 = arith.mulf %14, %14 : vector<2x256xf32>
    %cst_10 = arith.constant dense<0.000000e+00> : vector<256xf32>
    %16 = vector.multi_reduction <add>, %15, %cst_10 [0] : vector<2x256xf32> to vector<256xf32>
    %17 = vector.shape_cast %16 : vector<256xf32> to vector<1x256xf32>
    %cst_11 = arith.constant 2.000000e+00 : f32
    %18 = vector.broadcast %cst_11 : f32 to vector<1x256xf32>
    %19 = arith.divf %17, %18 : vector<1x256xf32>
    %20 = vector.broadcast %12 : vector<1x256xf32> to vector<2x256xf32>
    %21 = arith.subf %8, %20 : vector<2x256xf32>
    %cst_12 = arith.constant 9.99999974E-6 : f32
    %22 = vector.broadcast %cst_12 : f32 to vector<1x256xf32>
    %23 = arith.addf %19, %22 : vector<1x256xf32>
    %24 = math.rsqrt %23 : vector<1x256xf32>
    %25 = vector.broadcast %24 : vector<1x256xf32> to vector<2x256xf32>
    %26 = arith.mulf %21, %25 : vector<2x256xf32>
    %c0_13 = arith.constant 0 : index
    %c0_14 = arith.constant 0 : index
    %27 = vector.load %arg3[%c0_13, %c0_14] : memref<1x256xf32, #tpu.memory_space<vmem>>, vector<1x256xf32>
    %28 = vector.broadcast %27 : vector<1x256xf32> to vector<2x256xf32>
    %29 = arith.mulf %26, %28 : vector<2x256xf32>
    %c0_15 = arith.constant 0 : index
    %c0_16 = arith.constant 0 : index
    %30 = vector.load %arg4[%c0_15, %c0_16] : memref<1x256xf32, #tpu.memory_space<vmem>>, vector<1x256xf32>
    %31 = vector.broadcast %30 : vector<1x256xf32> to vector<2x256xf32>
    %32 = arith.addf %29, %31 : vector<2x256xf32>
    %c0_17 = arith.constant 0 : index
    %c0_18 = arith.constant 0 : index
    %33 = vector.load %arg5[%c0_17, %c0_18] : memref<2x256xf32, #tpu.memory_space<vmem>>, vector<2x256xf32>
    tpu.vector_store %arg5[%c0_17, %c0_18], %32 {strides = array<i32>} : memref<2x256xf32, #tpu.memory_space<vmem>>, vector<2x256xf32>,
    return
  }
}

</mosaic_0001>

<bundles_post_ra>
// kernel: tpu_custom_call.1
= control target key start
LH: loop header
LB: loop body
LE: loop exit
PB: predicated region body
PF: predicated region fallthrough
CT: control target
= control target key end

     0   :  { %vm29_vm0 = vcmask 1042432   ;;  %s367_s0 = inlined_call_operand.vmem [shape: f32[2,3,256], index: 0, kind: input, shape index: {}]   ;;  %s368_s1 = inlined_call_operand.vmem [shape: f32[3,256], index: 1, kind: input, shape index: {}]   ;;  %s369_s2 = inlined_call_operand.vmem [shape: f32[1,256], index: 2, kind: input, shape index: {}]   ;;  %s370_s3 = inlined_call_operand.vmem [shape: f32[1,256], index: 3, kind: input, shape index: {}]   ;;  %s371_s4 = inlined_call_operand.vmem [shape: f32[1,256], index: 4, kind: input, shape index: {}]   ;;  %s372_s5 = inlined_call_operand.hbm [shape: f32[2,256], index: 5, kind: output, shape index: {}]  }
   0x1   :  { %v21_v0 = vld [vmem:[%s367_s0] sm:$0x77]  ;;  %v22_v1 = vld [vmem:[%s367_s0 + $0x8] sm:$0x77] }
   0x2   :  { %v25_v2 = vcombine.high %v21_v0, %v21_v0  ;;  %v30_v3 = vsel %vm29_vm0, %v21_v0, 0.0  ;;  %v26_v4 = vcombine.high %v22_v1, %v22_v1 }
   0x3   :  { %10 = vsyncpa [#allocation3], 0  ;;  %v35_v6 = vsel %vm29_vm0, %v22_v1, 0.0  ;;  %v43_v10 = vld [vmem:[%s368_s1] sm:$0x77]  ;;  %v285_v12 = vmov 0.0   ;;  %v46_v13 = vlaneseq }
   0x4   :  { %v31_v5 = vsel %vm29_vm0, %v25_v2, 0.0  ;;  %v36_v7 = vsel %vm29_vm0, %v26_v4, 0.0  ;;  %v71_v11 = vcombine.high %v43_v10, %v43_v10  ;;  %143 = vmatprep.mubr.f32.mxu0 %v285_v12  ;;  %vm68_vm1 = vcmask 1041409   ;;  %v44_v25 = vld [vmem:[%s369_s2] sm:$0x3] }
   0x5   :  { %v32_v8 = vadd.f32 %v31_v5, %v30_v3  ;;  %v37_v9 = vadd.f32 %v36_v7, %v35_v6  ;;  %v47_v14 = vshrl.u32 %v46_v13, 7  ;;  %v59_v15 = vand.u32 127, %v46_v13  ;;  %v194_v7 = vld [vmem:[%s370_s3] sm:$0x3]  ;;  %s286_s3 = smov [#allocation2]  }
   0x6   :  { %248 = vmatprep.subr.msk.mxu0 %vm29_vm0, %v71_v11  ;;  %vm72_vm2 = vcmask 23552   ;;  %vm150_vm3 = vcmask 1041408   ;;  %s240_s27 = sshll.u32 %s286_s3, 4  ;;  %s241_s27 = int_to_ptr.vmem [resolvable:$true] %s240_s27 }
   0x7   :  { %33 = vadd.xlane.f32.xlu0 %v32_v8  ;;  %249 = vmatpush1.msk.msra.mxu0 %vm29_vm0, %v43_v10  ;;  %v62_v17 = vsub.s32 %v59_v15, %v47_v14  ;;  %v332_v24 = vsub.s32 0, %v47_v14  ;;  %v337_v26 = vsub.s32 1, %v47_v14  ;;  %v208_v8 = vld [vmem:[%s371_s4] sm:$0x3]  ;;  %s261_s4 = scalar_lea.vmem %s241_s27, 64  ;;  %p266_p1 = scmp.lt.s32.totalorder %s241_s27, %s241_s27 }
   0x8   :  { %p262_p0 = scmp.ne.s32.totalorder %s241_s27, %s261_s4  ;;  %p267_p2 = scmp.lt.s32.totalorder %s261_s4, %s261_s4 }
   0x9   :  { %v49_v27 = vrot.slane %v44_v25, %v332_v24  ;;  %v53_v28 = vrot.slane %v44_v25, %v337_v26  ;;  %v203_v11 = vrot.slane %v194_v7, %v337_v26  ;;  %v213_v14 = vrot.slane %v208_v8, %v332_v24 }
   0xa   :  { %p268_p3 = por %p267_p2, %p266_p1 }
   0xb   :  { %38 = vadd.xlane.f32.xlu0 %v37_v9  ;;  %v199_v9 = vrot.slane %v194_v7, %v332_v24 }
   0xc   :  { %p269_p4 = pnand %p268_p3, %p262_p0 }
  0x94   :  { %v34_v16 = vpop.xlane.xlu0 %33 }
  0x95   :  { %v41_v18 = vmul.f32 0.00390625, %v34_v16  ;;  %v217_v16 = vrot.slane %v208_v8, %v337_v26 }
  0x97   :  { %v63_v21 = vrot.slane %v41_v18, %v62_v17 }
  0x98   :  { %v39_v19 = vpop.xlane.xlu0 %38 }
  0x99   :  { %v42_v20 = vmul.f32 0.00390625, %v39_v19 }
  0x9b   :  { %v67_v22 = vrot.slane %v42_v20, %v62_v17 }
  0x9d   :  { %v69_v23 = vsel %vm68_vm1, %v67_v22, %v63_v21 }
  0x9e   :  { %250 = vmatmul.mubr.msk.f32.vlgmr.msra.gmra.mrb[0].mxu0 %vm72_vm2, %v69_v23 }
 0x171   :  { %v145_v29 = vpop.f32.mrb[0].mxu0 }
 0x172   :  { %v146_v30 = vadd.f32 %v145_v29, %v49_v27  ;;  %v147_v31 = vpop.f32.mrb[1].mxu0 }
 0x173   :  { %v148_v32 = vadd.f32 %v147_v31, %v53_v28 }
 0x174   :  { %v151_v33 = vsel %vm150_vm3, %v146_v30, 0.0 }
 0x175   :  { %v152_v34 = vrot.slane %v151_v33, 4  ;;  %v158_v35 = vsel %vm150_vm3, %v148_v32, 0.0 }
 0x176   :  { %v159_v36 = vrot.slane %v158_v35, 4 }
 0x177   :  { %v153_v37 = vadd.f32 %v152_v34, %v151_v33 }
 0x178   :  { %v160_v38 = vadd.f32 %v159_v36, %v158_v35 }
 0x179   :  { %v154_v39 = vrot.slane %v153_v37, 2 }
 0x17a   :  { %v161_v40 = vrot.slane %v160_v38, 2 }
 0x17b   :  { %v155_v41 = vadd.f32 %v154_v39, %v153_v37 }
 0x17c   :  { %v162_v42 = vadd.f32 %v161_v40, %v160_v38 }
 0x17d   :  { %v156_v43 = vrot.slane %v155_v41, 1 }
 0x17e   :  { %v163_v44 = vrot.slane %v162_v42, 1 }
 0x17f   :  { %v157_v45 = vadd.f32 %v156_v43, %v155_v41 }
 0x180   :  { %v164_v46 = vadd.f32 %v163_v44, %v162_v42 }
 0x181   :  { %v166_v47 = vmul.f32 0.5, %v157_v45 }
 0x182   :  { %v167_v48 = vmul.f32 0.5, %v164_v46 }
 0x183   :  { %v168_v49 = vsub.f32 %v146_v30, %v166_v47 }
 0x184   :  { %v169_v50 = vsub.f32 %v148_v32, %v167_v48 }
 0x185   :  { %v170_v51 = vmul.f32 %v168_v49, %v168_v49 }
 0x186   :  { %v171_v52 = vmul.f32 %v169_v50, %v169_v50 }
 0x187   :  { %v172_v53 = vsel %vm150_vm3, %v170_v51, 0.0 }
 0x188   :  { %v173_v54 = vrot.slane %v172_v53, 4  ;;  %v179_v55 = vsel %vm150_vm3, %v171_v52, 0.0 }
 0x189   :  { %v180_v56 = vrot.slane %v179_v55, 4 }
 0x18a   :  { %v174_v57 = vadd.f32 %v173_v54, %v172_v53 }
 0x18b   :  { %v181_v58 = vadd.f32 %v180_v56, %v179_v55 }
 0x18c   :  { %v175_v59 = vrot.slane %v174_v57, 2 }
 0x18d   :  { %v182_v60 = vrot.slane %v181_v58, 2 }
 0x18e   :  { %v176_v61 = vadd.f32 %v175_v59, %v174_v57 }
 0x18f   :  { %v183_v62 = vadd.f32 %v182_v60, %v181_v58 }
 0x190   :  { %v177_v63 = vrot.slane %v176_v61, 1 }
 0x191   :  { %v184_v0 = vrot.slane %v183_v62, 1 }
 0x192   :  { %v178_v1 = vadd.f32 %v177_v63, %v176_v61 }
 0x193   :  { %v185_v2 = vadd.f32 %v184_v0, %v183_v62 }
 0x194   :  { %v186_v3 = vmul.f32 0.5, %v178_v1 }
 0x195   :  { %v187_v4 = vmul.f32 0.5, %v185_v2 }
 0x196   :  { %v188_v5 = vadd.f32 1e-05, %v186_v3 }
 0x197   :  { %v189_v6 = vadd.f32 1e-05, %v187_v4 }
 0x198   :  { %257 = vrsqrt.f32 %v188_v5 }
 0x199   :  { %259 = vrsqrt.f32 %v189_v6 }
 0x1a2   :  { %v258_v10 = vpop.eup %257 }
 0x1a3   :  { %v260_v12 = vpop.eup %259  ;;  %v192_v13 = vmul.f32 %v258_v10, %v168_v49 }
 0x1a4   :  { %v193_v15 = vmul.f32 %v260_v12, %v169_v50 }
 0x1a5   :  { %v206_v17 = vmul.f32 %v199_v9, %v192_v13 }
 0x1a6   :  { %v207_v18 = vmul.f32 %v203_v11, %v193_v15 }
 0x1a7   :  { %v220_v19 = vadd.f32 %v213_v14, %v206_v17 }
 0x1a8   :  { %v221_v20 = vadd.f32 %v217_v16, %v207_v18 }
 0x1aa   :  { %v224_v21 = vcombine.low %v220_v19, %v221_v20 }
 0x1ac   :  { %251 = vst.sshfl [vmem:[#allocation2] sm:$0x33 pattern:$0x76325410] %v224_v21 }
 0x1ad   :  { %272 = shalt.err (!%p269_p4)
}
 0x1ae   :  { %s273_s30 = scalar_lea.hbm %s372_s5, 64 }
 0x1af   :  { %p274_p5 = scmp.ne.s32.totalorder %s372_s5, %s273_s30  ;;  %p277_p6 = scmp.lt.u32.totalorder %s273_s30, %s372_s5 }
 0x1b1   :  { %p279_p7 = pnand %p277_p6, %p274_p5 }
 0x1b3   :  { %282 = shalt.err (!%p279_p7)
}
 0x1b4   :  { %243 = dma.vmem_to_hbm [thread:$0]  %s241_s27, 64, %s372_s5, [#allocation3]  }
 0x1b5   :  { %283 = dma.done.wait [#allocation3], 64  }
 0x1b6   :  { %284 = vsyncadd [#allocation3], 4294967232 }
 0x1b7   :  { %247 = vsyncpa [#allocation3], 1 }

</bundles_post_ra>
